<compile_context>
chip_gen: v6e
topology: v6e:2x2x1
jax: 0.10.0
libtpu: 0.0.40
codegen_flags: <defaults>
</compile_context>

<pallas_src>
import collections

import jax
import jax.numpy as jnp
from jax.experimental import pallas as pl
from jax.experimental.pallas import tpu as pltpu

NamedTuple = collections.namedtuple("NamedTuple", ["prior", "posterior", "policy"])

# Model dims (synthetic, deterministic)
HID = 32      # hidden width
D_TASK = 8    # task head width
K_CAT = 8     # prior / policy categories
L_LAT = 16    # latent (sample) width

HEADS = D_TASK + K_CAT + L_LAT + K_CAT   # 40 useful lanes
HEADS_PAD = 128                          # lane-dense output slab width

TASK_LO, TASK_HI = 0, D_TASK
PRIOR_LO, PRIOR_HI = TASK_HI, TASK_HI + K_CAT
SAMPLE_LO, SAMPLE_HI = PRIOR_HI, PRIOR_HI + L_LAT
POLICY_LO, POLICY_HI = SAMPLE_HI, SAMPLE_HI + K_CAT


def pathscale_kernel(feats0_ref, feats_rest_ref, mask_ref, cond_ref,
                     w_x_ref, w_c_ref, b_ref, w_heads_ref,
                     out0_ref, out_rest_ref):
  """Fused per-scale forward: frame-0 rows + remaining frame rows in one kernel."""
  w_x = w_x_ref[...]
  w_heads = w_heads_ref[...]
  b = b_ref[...]                                   # (1, HID) broadcasts over rows

  # ---- frame-0 rows: mask multiply and conditioning folded in-kernel ----
  f0 = feats0_ref[...] * mask_ref[...]
  h0 = jnp.dot(f0, w_x, preferred_element_type=jnp.float32)
  h0 = h0 + jnp.dot(cond_ref[...], w_c_ref[...], preferred_element_type=jnp.float32)
  h0 = jnp.maximum(h0 + b, 0.0)
  logits0 = jnp.dot(h0, w_heads, preferred_element_type=jnp.float32)   # (B, 128)

  # ---- remaining frames: no mask, no conditioning (mask=None, sample=None path) ----
  hr = jnp.dot(feats_rest_ref[...], w_x, preferred_element_type=jnp.float32)
  hr = jnp.maximum(hr + b, 0.0)
  logits_r = jnp.dot(hr, w_heads, preferred_element_type=jnp.float32)  # (R, 128)

  def lane_masks(n):
    lane = jax.lax.broadcasted_iota(jnp.int32, (n, HEADS_PAD), 1)
    return (lane < TASK_HI,
            (lane >= PRIOR_LO) & (lane < PRIOR_HI),
            (lane >= SAMPLE_LO) & (lane < SAMPLE_HI),
            (lane >= POLICY_LO) & (lane < POLICY_HI))

  def seg_softmax(x, seg):
    # Pad / foreign lanes are forced to -inf so they contribute exp(-inf)=0.
    xm = jnp.where(seg, x, -jnp.inf)
    m = jnp.max(xm, axis=-1, keepdims=True)
    e = jnp.exp(xm - m)
    s = jnp.sum(e, axis=-1, keepdims=True)
    return e * pl.reciprocal(s, approx=True)

  is_task, is_prior, is_sample, is_policy = lane_masks(logits0.shape[0])
  out0 = jnp.where(is_task, logits0, 0.0)
  out0 = jnp.where(is_prior, seg_softmax(logits0, is_prior), out0)
  out0 = jnp.where(is_sample, jnp.tanh(logits0), out0)
  out0 = jnp.where(is_policy, seg_softmax(logits0, is_policy), out0)
  out0_ref[...] = out0

  # Only the latent sample of the extra frames is consumed by PathNet.
  _, _, is_sample_r, _ = lane_masks(logits_r.shape[0])
  out_rest_ref[...] = jnp.where(is_sample_r, jnp.tanh(logits_r), 0.0)


def _run_scale(feats0, feats_rest, mask2d, cond, params):
  vmem = pl.BlockSpec(memory_space=pltpu.MemorySpace.VMEM)
  out_shape = (
      jax.ShapeDtypeStruct((feats0.shape[0], HEADS_PAD), jnp.float32),
      jax.ShapeDtypeStruct((feats_rest.shape[0], HEADS_PAD), jnp.float32),
  )
  return pl.pallas_call(
      pathscale_kernel,
      out_shape=out_shape,
      in_specs=[vmem] * 8,
      out_specs=(vmem, vmem),
  )(feats0, feats_rest, mask2d, cond,
    params["w_in"], params["w_cond"], params["b"], params["w_heads"])


def scale_net_forward(inp_bt, msk, prev_sample, params):
  """One fused Pallas call per scale (frame 0 + rest frames)."""
  inp = jnp.swapaxes(inp_bt, 0, 1)                 # (T, B, C, H, W)
  t, b = inp.shape[0], inp.shape[1]
  feat_dim = inp.shape[2] * inp.shape[3] * inp.shape[4]

  feats0 = inp[0].reshape(b, feat_dim).astype(jnp.float32)
  if t > 1:
    feats_rest = inp[1:].reshape((t - 1) * b, feat_dim).astype(jnp.float32)
  else:
    feats_rest = feats0                            # dummy rows; out_rest discarded

  mask2d = (jnp.ones((b, feat_dim), jnp.float32) if msk is None
            else msk.reshape(b, feat_dim).astype(jnp.float32))
  fc = params["w_cond"].shape[0]
  cond = (jnp.zeros((b, fc), jnp.float32) if prev_sample is None
          else prev_sample.reshape(b, fc).astype(jnp.float32))

  out0, out_rest = _run_scale(feats0, feats_rest, mask2d, cond, params)

  task = out0[:, TASK_LO:TASK_HI]
  prior = out0[:, PRIOR_LO:PRIOR_HI]
  sample = out0[:, SAMPLE_LO:SAMPLE_HI]
  policy = out0[:, POLICY_LO:POLICY_HI]
  if t > 1:
    sample = jnp.concatenate([sample, out_rest[:, SAMPLE_LO:SAMPLE_HI]], axis=0)
  sample = jnp.swapaxes(sample.reshape(t, b, L_LAT), 0, 1)   # (B, T, L_LAT)
  return task, prior, sample, policy


def pathnet_forward(data, scale_params):
  """Mirrors PathNet.forward (transpose / slice / reshape / concat / list slicing)."""
  inputs, masks = data
  sample = None
  policies, priors, posteriors, tasks = [], [], [], []
  for inp, msk, params in zip(inputs, masks, scale_params):
    task, prior, sample, policy = scale_net_forward(inp, msk, sample, params)
    policies.append(policy)
    priors.append(prior)
    posteriors.append(sample)
    tasks.append(task)
  return tasks, NamedTuple(prior=priors[1:], posterior=posteriors[:-1],
                           policy=policies[1:])


# ---------------- pure-JAX reference (faithful to the PyTorch structure) ----------------
def _ref_scale_net(x, mask, sample, params):
  n = x.shape[0]
  xm = x * mask if mask is not None else x
  feats = xm.reshape(n, -1).astype(jnp.float32)
  fc = params["w_cond"].shape[0]
  cond = sample.reshape(n, -1).astype(jnp.float32) if sample is not None \
      else jnp.zeros((n, fc), jnp.float32)
  h = jnp.maximum(feats @ params["w_in"] + cond @ params["w_cond"] + params["b"], 0.0)
  return (h @ params["w_task"],
          (jax.nn.softmax(h @ params["w_prior"], axis=-1),
           jnp.tanh(h @ params["w_lat"]),
           jax.nn.softmax(h @ params["w_pol"], axis=-1)))


def _ref_pathnet(data, scale_params):
  inputs, masks = data
  sample = None
  policies, priors, posteriors, tasks = [], [], [], []
  for inp, msk, params in zip(inputs, masks, scale_params):
    inp = jnp.swapaxes(inp, 0, 1)
    shape = inp.shape
    task, (prior, sample, policy) = _ref_scale_net(inp[0], msk, sample, params)
    if inp.shape[0] > 1:
      rest = inp[1:].reshape(-1, *inp.shape[2:])
      _, (_, s_sample, _) = _ref_scale_net(rest, None, None, params)
      sample = jnp.concatenate((sample, s_sample), axis=0)
    sample = jnp.swapaxes(sample.reshape(*shape[:2], *sample.shape[1:]), 0, 1)
    policies.append(policy); priors.append(prior)
    posteriors.append(sample); tasks.append(task)
  return tasks, NamedTuple(prior=priors[1:], posterior=posteriors[:-1],
                           policy=policies[1:])


# ---------------- deterministic parameter init ----------------
def init_scale_params(key, feat_dim, cond_dim):
  ks = jax.random.split(key, 7)
  def lin(k, shape, fan_in):
    return jax.random.normal(k, shape, jnp.float32) / jnp.sqrt(fan_in)
  p = dict(
      w_in=lin(ks[0], (feat_dim, HID), feat_dim),
      w_cond=lin(ks[1], (cond_dim, HID), cond_dim),
      b=jax.random.normal(ks[2], (1, HID), jnp.float32) * 0.01,
      w_task=lin(ks[3], (HID, D_TASK), HID),
      w_prior=lin(ks[4], (HID, K_CAT), HID),
      w_lat=lin(ks[5], (HID, L_LAT), HID),
      w_pol=lin(ks[6], (HID, K_CAT), HID),
  )
  # Fused, zero-padded head weight -> lane-dense (HID, 128) kernel operand.
  heads = jnp.concatenate([p["w_task"], p["w_prior"], p["w_lat"], p["w_pol"]], axis=1)
  p["w_heads"] = jnp.pad(heads, ((0, 0), (0, HEADS_PAD - HEADS)))
  return p


if __name__ == "__main__":
  key = jax.random.PRNGKey(0)
  B, C = 8, 4                       # B=8 fills whole sublane groups
  scale_cfg = [(4, 8, 8), (4, 4, 4)]   # (T, H, W) per scale

  k_in, k_mask, k_par = jax.random.split(key, 3)
  kin = jax.random.split(k_in, len(scale_cfg))
  kmk = jax.random.split(k_mask, len(scale_cfg))
  kpr = jax.random.split(k_par, len(scale_cfg))

  inputs, masks, scale_params = [], [], []
  prev_T = None
  for i, (T, H, W) in enumerate(scale_cfg):
    inputs.append(jax.random.normal(kin[i], (B, T, C, H, W), jnp.float32))
    masks.append((jax.random.uniform(kmk[i], (B, C, H, W)) > 0.3).astype(jnp.float32))
    feat_dim = C * H * W
    cond_dim = L_LAT if prev_T is None else prev_T * L_LAT  # scale-0 cond never used
    scale_params.append(init_scale_params(kpr[i], feat_dim, cond_dim))
    prev_T = T

  data = (inputs, masks)
  tasks, bundle = pathnet_forward(data, scale_params)
  tasks_r, bundle_r = _ref_pathnet(data, scale_params)

  # correctness vs pure-JAX reference (softmax heads relaxed for approx reciprocal)
  for a, r in zip(tasks, tasks_r):
    assert jnp.allclose(a, r, atol=1e-4), "task mismatch"
  for a, r in zip(bundle.posterior, bundle_r.posterior):
    assert jnp.allclose(a, r, atol=1e-3), "posterior mismatch"
  for a, r in zip(bundle.prior, bundle_r.prior):
    assert jnp.allclose(a, r, atol=5e-3), "prior mismatch"
  for a, r in zip(bundle.policy, bundle_r.policy):
    assert jnp.allclose(a, r, atol=5e-3), "policy mismatch"

  jax.block_until_ready((tasks, bundle.prior, bundle.posterior, bundle.policy))
  print("KERNEL_OK")
</pallas_src>

<mosaic_0001>
module attributes {stable_mosaic.version = 11 : i64} {
  func.func @pathscale_kernel(%arg0: memref<8x256xf32, #tpu.memory_space<vmem>>, %arg1: memref<24x256xf32, #tpu.memory_space<vmem>>, %arg2: memref<8x256xf32, #tpu.memory_space<vmem>>, %arg3: memref<8x16xf32, #tpu.memory_space<vmem>>, %arg4: memref<256x32xf32, #tpu.memory_space<vmem>>, %arg5: memref<16x32xf32, #tpu.memory_space<vmem>>, %arg6: memref<1x32xf32, #tpu.memory_space<vmem>>, %arg7: memref<32x128xf32, #tpu.memory_space<vmem>>, %arg8: memref<8x128xf32, #tpu.memory_space<vmem>>, %arg9: memref<24x128xf32, #tpu.memory_space<vmem>>) attributes {dimension_semantics = [], scalar_prefetch = 0 : i64, scratch_operands = 0 : i64, tpu.core_type = #tpu.core_type<tc>} {
    %c0 = arith.constant 0 : index
    %c0_0 = arith.constant 0 : index
    %0 = vector.load %arg4[%c0, %c0_0] : memref<256x32xf32, #tpu.memory_space<vmem>>, vector<256x32xf32>
    %c0_1 = arith.constant 0 : index
    %c0_2 = arith.constant 0 : index
    %1 = vector.load %arg7[%c0_1, %c0_2] : memref<32x128xf32, #tpu.memory_space<vmem>>, vector<32x128xf32>
    %c0_3 = arith.constant 0 : index
    %c0_4 = arith.constant 0 : index
    %2 = vector.load %arg6[%c0_3, %c0_4] : memref<1x32xf32, #tpu.memory_space<vmem>>, vector<1x32xf32>
    %c0_5 = arith.constant 0 : index
    %c0_6 = arith.constant 0 : index
    %3 = vector.load %arg0[%c0_5, %c0_6] : memref<8x256xf32, #tpu.memory_space<vmem>>, vector<8x256xf32>
    %c0_7 = arith.constant 0 : index
    %c0_8 = arith.constant 0 : index
    %4 = vector.load %arg2[%c0_7, %c0_8] : memref<8x256xf32, #tpu.memory_space<vmem>>, vector<8x256xf32>
    %5 = arith.mulf %3, %4 : vector<8x256xf32>
    %cst = arith.constant dense<0.000000e+00> : vector<8x32xf32>
    %6 = tpu.matmul %5, %0, %cst {dimension_numbers = #tpu.dot_dimension_numbers<[1], [0], [0], [1], [0, 0, 1, 1], [], []>} : vector<8x256xf32>, vector<256x32xf32>, vector<8x32xf32> -> vector<8x32xf32>
    %c0_9 = arith.constant 0 : index
    %c0_10 = arith.constant 0 : index
    %7 = vector.load %arg3[%c0_9, %c0_10] : memref<8x16xf32, #tpu.memory_space<vmem>>, vector<8x16xf32>
    %c0_11 = arith.constant 0 : index
    %c0_12 = arith.constant 0 : index
    %8 = vector.load %arg5[%c0_11, %c0_12] : memref<16x32xf32, #tpu.memory_space<vmem>>, vector<16x32xf32>
    %cst_13 = arith.constant dense<0.000000e+00> : vector<8x32xf32>
    %9 = tpu.matmul %7, %8, %cst_13 {dimension_numbers = #tpu.dot_dimension_numbers<[1], [0], [0], [1], [0, 0, 1, 1], [], []>} : vector<8x16xf32>, vector<16x32xf32>, vector<8x32xf32> -> vector<8x32xf32>
    %10 = arith.addf %6, %9 : vector<8x32xf32>
    %11 = vector.broadcast %2 : vector<1x32xf32> to vector<8x32xf32>
    %12 = arith.addf %10, %11 : vector<8x32xf32>
    %cst_14 = arith.constant 0.000000e+00 : f32
    %13 = vector.broadcast %cst_14 : f32 to vector<8x32xf32>
    %14 = arith.maximumf %12, %13 : vector<8x32xf32>
    %cst_15 = arith.constant dense<0.000000e+00> : vector<8x128xf32>
    %15 = tpu.matmul %14, %1, %cst_15 {dimension_numbers = #tpu.dot_dimension_numbers<[1], [0], [0], [1], [0, 0, 1, 1], [], []>} : vector<8x32xf32>, vector<32x128xf32>, vector<8x128xf32> -> vector<8x128xf32>
    %c0_16 = arith.constant 0 : index
    %c0_17 = arith.constant 0 : index
    %16 = vector.load %arg1[%c0_16, %c0_17] : memref<24x256xf32, #tpu.memory_space<vmem>>, vector<24x256xf32>
    %cst_18 = arith.constant dense<0.000000e+00> : vector<24x32xf32>
    %17 = tpu.matmul %16, %0, %cst_18 {dimension_numbers = #tpu.dot_dimension_numbers<[1], [0], [0], [1], [0, 0, 1, 1], [], []>} : vector<24x256xf32>, vector<256x32xf32>, vector<24x32xf32> -> vector<24x32xf32>
    %18 = vector.broadcast %2 : vector<1x32xf32> to vector<24x32xf32>
    %19 = arith.addf %17, %18 : vector<24x32xf32>
    %cst_19 = arith.constant 0.000000e+00 : f32
    %20 = vector.broadcast %cst_19 : f32 to vector<24x32xf32>
    %21 = arith.maximumf %19, %20 : vector<24x32xf32>
    %cst_20 = arith.constant dense<0.000000e+00> : vector<24x128xf32>
    %22 = tpu.matmul %21, %1, %cst_20 {dimension_numbers = #tpu.dot_dimension_numbers<[1], [0], [0], [1], [0, 0, 1, 1], [], []>} : vector<24x32xf32>, vector<32x128xf32>, vector<24x128xf32> -> vector<24x128xf32>
    %23 = tpu.iota {dimensions = array<i32: 1>} : vector<8x128xi32>
    %c8_i32 = arith.constant 8 : i32
    %24 = vector.broadcast %c8_i32 : i32 to vector<8x128xi32>
    %25 = arith.cmpi slt, %23, %24 : vector<8x128xi32>
    %c8_i32_21 = arith.constant 8 : i32
    %26 = vector.broadcast %c8_i32_21 : i32 to vector<8x128xi32>
    %27 = arith.cmpi sge, %23, %26 : vector<8x128xi32>
    %c16_i32 = arith.constant 16 : i32
    %28 = vector.broadcast %c16_i32 : i32 to vector<8x128xi32>
    %29 = arith.cmpi slt, %23, %28 : vector<8x128xi32>
    %30 = arith.andi %27, %29 : vector<8x128xi1>
    %c16_i32_22 = arith.constant 16 : i32
    %31 = vector.broadcast %c16_i32_22 : i32 to vector<8x128xi32>
    %32 = arith.cmpi sge, %23, %31 : vector<8x128xi32>
    %c32_i32 = arith.constant 32 : i32
    %33 = vector.broadcast %c32_i32 : i32 to vector<8x128xi32>
    %34 = arith.cmpi slt, %23, %33 : vector<8x128xi32>
    %35 = arith.andi %32, %34 : vector<8x128xi1>
    %c32_i32_23 = arith.constant 32 : i32
    %36 = vector.broadcast %c32_i32_23 : i32 to vector<8x128xi32>
    %37 = arith.cmpi sge, %23, %36 : vector<8x128xi32>
    %c40_i32 = arith.constant 40 : i32
    %38 = vector.broadcast %c40_i32 : i32 to vector<8x128xi32>
    %39 = arith.cmpi slt, %23, %38 : vector<8x128xi32>
    %40 = arith.andi %37, %39 : vector<8x128xi1>
    %cst_24 = arith.constant 0.000000e+00 : f32
    %41 = vector.broadcast %cst_24 : f32 to vector<8x128xf32>
    %42 = arith.select %25, %15, %41 : vector<8x128xi1>, vector<8x128xf32>
    %cst_25 = arith.constant 0xFF800000 : f32
    %43 = vector.broadcast %cst_25 : f32 to vector<8x128xf32>
    %44 = arith.select %30, %15, %43 : vector<8x128xi1>, vector<8x128xf32>
    %cst_26 = arith.constant dense<0xFF800000> : vector<8xf32>
    %45 = vector.multi_reduction <maximumf>, %44, %cst_26 [1] : vector<8x128xf32> to vector<8xf32>
    %46 = vector.shape_cast %45 : vector<8xf32> to vector<8x1xf32>
    %47 = vector.broadcast %46 : vector<8x1xf32> to vector<8x128xf32>
    %48 = arith.subf %44, %47 : vector<8x128xf32>
    %49 = math.exp %48 : vector<8x128xf32>
    %cst_27 = arith.constant dense<0.000000e+00> : vector<8xf32>
    %50 = vector.multi_reduction <add>, %49, %cst_27 [1] : vector<8x128xf32> to vector<8xf32>
    %51 = vector.shape_cast %50 : vector<8xf32> to vector<8x1xf32>
    %52 = tpu.reciprocal %51 {approx = true} : vector<8x1xf32> -> vector<8x1xf32>
    %53 = vector.broadcast %52 : vector<8x1xf32> to vector<8x128xf32>
    %54 = arith.mulf %49, %53 : vector<8x128xf32>
    %55 = arith.select %30, %54, %42 : vector<8x128xi1>, vector<8x128xf32>
    %56 = math.tanh %15 : vector<8x128xf32>
    %57 = arith.select %35, %56, %55 : vector<8x128xi1>, vector<8x128xf32>
    %cst_28 = arith.constant 0xFF800000 : f32
    %58 = vector.broadcast %cst_28 : f32 to vector<8x128xf32>
    %59 = arith.select %40, %15, %58 : vector<8x128xi1>, vector<8x128xf32>
    %cst_29 = arith.constant dense<0xFF800000> : vector<8xf32>
    %60 = vector.multi_reduction <maximumf>, %59, %cst_29 [1] : vector<8x128xf32> to vector<8xf32>
    %61 = vector.shape_cast %60 : vector<8xf32> to vector<8x1xf32>
    %62 = vector.broadcast %61 : vector<8x1xf32> to vector<8x128xf32>
    %63 = arith.subf %59, %62 : vector<8x128xf32>
    %64 = math.exp %63 : vector<8x128xf32>
    %cst_30 = arith.constant dense<0.000000e+00> : vector<8xf32>
    %65 = vector.multi_reduction <add>, %64, %cst_30 [1] : vector<8x128xf32> to vector<8xf32>
    %66 = vector.shape_cast %65 : vector<8xf32> to vector<8x1xf32>
    %67 = tpu.reciprocal %66 {approx = true} : vector<8x1xf32> -> vector<8x1xf32>
    %68 = vector.broadcast %67 : vector<8x1xf32> to vector<8x128xf32>
    %69 = arith.mulf %64, %68 : vector<8x128xf32>
    %70 = arith.select %40, %69, %57 : vector<8x128xi1>, vector<8x128xf32>
    %c0_31 = arith.constant 0 : index
    %c0_32 = arith.constant 0 : index
    %71 = vector.load %arg8[%c0_31, %c0_32] : memref<8x128xf32, #tpu.memory_space<vmem>>, vector<8x128xf32>
    tpu.vector_store %arg8[%c0_31, %c0_32], %70 {strides = array<i32>} : memref<8x128xf32, #tpu.memory_space<vmem>>, vector<8x128xf32>,
    %72 = tpu.iota {dimensions = array<i32: 1>} : vector<24x128xi32>
    %c16_i32_33 = arith.constant 16 : i32
    %73 = vector.broadcast %c16_i32_33 : i32 to vector<24x128xi32>
    %74 = arith.cmpi sge, %72, %73 : vector<24x128xi32>
    %c32_i32_34 = arith.constant 32 : i32
    %75 = vector.broadcast %c32_i32_34 : i32 to vector<24x128xi32>
    %76 = arith.cmpi slt, %72, %75 : vector<24x128xi32>
    %77 = arith.andi %74, %76 : vector<24x128xi1>
    %78 = math.tanh %22 : vector<24x128xf32>
    %cst_35 = arith.constant 0.000000e+00 : f32
    %79 = vector.broadcast %cst_35 : f32 to vector<24x128xf32>
    %80 = arith.select %77, %78, %79 : vector<24x128xi1>, vector<24x128xf32>
    %c0_36 = arith.constant 0 : index
    %c0_37 = arith.constant 0 : index
    %81 = vector.load %arg9[%c0_36, %c0_37] : memref<24x128xf32, #tpu.memory_space<vmem>>, vector<24x128xf32>
    tpu.vector_store %arg9[%c0_36, %c0_37], %80 {strides = array<i32>} : memref<24x128xf32, #tpu.memory_space<vmem>>, vector<24x128xf32>,
    return
  }
}

</mosaic_0001>

<bundles_post_ra>
// kernel: tpu_custom_call.1
= control target key start
LH: loop header
LB: loop body
LE: loop exit
PB: predicated region body
PF: predicated region fallthrough
CT: control target
= control target key end

     0   :  { %15 = vsyncpa [#allocation3], 0  ;;  %v758_v4 = vmov 0.0   ;;  %vm759_vm0 = vmmov 0   ;;  %vm79_vm1 = vcmask 130048   ;;  %s1171_s0 = inlined_call_operand.vmem [shape: f32[8,256], index: 0, kind: input, shape index: {}]   ;;  %s1172_s1 = inlined_call_operand.vmem [shape: f32[24,256], index: 1, kind: input, shape index: {}]   ;;  %s1173_s2 = inlined_call_operand.vmem [shape: f32[8,256], index: 2, kind: input, shape index: {}]   ;;  %s1174_s3 = inlined_call_operand.vmem [shape: f32[8,16], index: 3, kind: input, shape index: {}]   ;;  %s1175_s4 = inlined_call_operand.vmem [shape: f32[256,32], index: 4, kind: input, shape index: {}]   ;;  %s1176_s5 = inlined_call_operand.vmem [shape: f32[16,32], index: 5, kind: input, shape index: {}]   ;;  %s1177_s6 = inlined_call_operand.vmem [shape: f32[1,32], index: 6, kind: input, shape index: {}]   ;;  %s1178_s7 = inlined_call_operand.vmem [shape: f32[32,128], index: 7, kind: input, shape index: {}]   ;;  %s1179_s8 = inlined_call_operand.hbm [shape: f32[8,128], index: 8, kind: output, shape index: {0}]   ;;  %s1180_s9 = inlined_call_operand.hbm [shape: f32[24,128], index: 9, kind: output, shape index: {1}]  }
   0x1   :  { %v817_v0 = vld [vmem:[%s1175_s4 + $0xf8] sm:$0xff]  ;;  %v827_v2 = vld [vmem:[%s1175_s4 + $0xf0] sm:$0xff]  ;;  %657 = vmatprep.subr.mxu0 %v758_v4  ;;  %v840_v5 = vld [vmem:[%s1175_s4 + $0xe8] sm:$0xff]  ;;  %661 = vmatprep.mubr.msk.f32.mxu0 %vm759_vm0, %v758_v4 }
   0x2   :  { %v822_v1 = vld [vmem:[%s1175_s4 + $0x78] sm:$0xff]  ;;  %569 = vmatprep.subr.mxu1 %v817_v0  ;;  %v833_v3 = vld [vmem:[%s1175_s4 + $0x70] sm:$0xff]  ;;  %v848_v6 = vld [vmem:[%s1175_s4 + $0x68] sm:$0xff] }
   0x3   :  { %570 = vmatpush3.msra.mxu1 %v822_v1  ;;  %v854_v7 = vld [vmem:[%s1175_s4 + $0xe0] sm:$0xff]  ;;  %v866_v9 = vld [vmem:[%s1175_s4 + $0xd8] sm:$0xff]  ;;  %v878_v11 = vld [vmem:[%s1175_s4 + $0xd0] sm:$0xff] }
   0x4   :  { %571 = vmatprep.subr.mxu1 %v827_v2  ;;  %v860_v8 = vld [vmem:[%s1175_s4 + $0x60] sm:$0xff]  ;;  %v872_v10 = vld [vmem:[%s1175_s4 + $0x58] sm:$0xff]  ;;  %v884_v12 = vld [vmem:[%s1175_s4 + $0x50] sm:$0xff] }
   0x5   :  { %572 = vmatpush3.msra.mxu1 %v833_v3  ;;  %v890_v13 = vld [vmem:[%s1175_s4 + $0xc8] sm:$0xff]  ;;  %v911_v18 = vld [vmem:[%s1175_s4 + $0xc0] sm:$0xff] }
   0x6   :  { %573 = vmatprep.subr.mxu1 %v840_v5  ;;  %v78_v14 = vld [vmem:[%s1176_s5 + $0x8] sm:$0xff]  ;;  %v77_v20 = vld [vmem:[%s1176_s5] sm:$0xff] }
   0x7   :  { %574 = vmatpush3.msra.mxu1 %v848_v6  ;;  %v899_v15 = vld [vmem:[%s1175_s4 + $0x48] sm:$0xff]  ;;  %658 = vmatpush3.msra.mxu0 %v78_v14  ;;  %v76_v21 = vld [vmem:[%s1174_s3] sm:$0xff] }
   0x8   :  { %575 = vmatprep.subr.mxu1 %v854_v7  ;;  %v71_v16 = vld [vmem:[%s1171_s0 + $0x8] sm:$0xff]  ;;  %659 = vmatprep.subr.mxu0 %v758_v4  ;;  %v924_v22 = vld [vmem:[%s1175_s4 + $0x40] sm:$0xff] }
   0x9   :  { %576 = vmatpush3.msra.mxu1 %v860_v8  ;;  %v73_v17 = vld [vmem:[%s1173_s2 + $0x8] sm:$0xff]  ;;  %660 = vmatpush3.msra.mxu0 %v77_v20 }
   0xa   :  { %577 = vmatprep.subr.mxu1 %v866_v9  ;;  %v75_v19 = vmul.f32 %v73_v17, %v71_v16 }
   0xb   :  { %578 = vmatpush3.msra.mxu1 %v872_v10 }
   0xc   :  { %579 = vmatprep.subr.mxu1 %v878_v11 }
   0xd   :  { %580 = vmatpush3.msra.mxu1 %v884_v12 }
   0xe   :  { %581 = vmatprep.subr.mxu1 %v890_v13 }
   0xf   :  { %16 = vsyncpa [#allocation5], 0  ;;  %582 = vmatpush3.msra.mxu1 %v899_v15  ;;  %v930_v23 = vld [vmem:[%s1175_s4 + $0xb8] sm:$0xff]  ;;  %217 = vmatprep.mubr.f32.mxu1 %v75_v19  ;;  %v942_v25 = vld [vmem:[%s1175_s4 + $0xb0] sm:$0xff]  ;;  %vm231_vm2 = vcmask 261120   ;;  %v483_v61 = vlaneseq }
  0x10   :  { %583 = vmatprep.subr.mxu1 %v911_v18  ;;  %v936_v24 = vld [vmem:[%s1175_s4 + $0x38] sm:$0xff]  ;;  %662 = vmatmul.mubr.msk.f32.vlgmr.msra.gmra.mxu0 %vm79_vm1, %v76_v21  ;;  %v949_v26 = vld [vmem:[%s1175_s4 + $0x30] sm:$0xff]  ;;  %v957_v27 = vld [vmem:[%s1175_s4 + $0xa8] sm:$0xff] }
  0x11   :  { %584 = vmatpush3.msra.mxu1 %v924_v22  ;;  %664 = vmatprep.subr.mxu0 %v758_v4  ;;  %v963_v28 = vld [vmem:[%s1175_s4 + $0x28] sm:$0xff]  ;;  %v969_v29 = vld [vmem:[%s1175_s4 + $0xa0] sm:$0xff]  ;;  %v981_v31 = vld [vmem:[%s1175_s4 + $0x98] sm:$0xff]  ;;  %v1112_v62 = vand.u32 127, %v483_v61 }
  0x12   :  { %585 = vmatprep.subr.mxu1 %v930_v23  ;;  %672 = vmatprep.mubr.msk.f32.mxu0 %vm759_vm0, %v758_v4  ;;  %v975_v30 = vld [vmem:[%s1175_s4 + $0x20] sm:$0xff]  ;;  %v987_v32 = vld [vmem:[%s1175_s4 + $0x18] sm:$0xff]  ;;  %v993_v33 = vld [vmem:[%s1175_s4 + $0x90] sm:$0xff] }
  0x13   :  { %586 = vmatpush3.msra.mxu1 %v936_v24  ;;  %v999_v34 = vld [vmem:[%s1175_s4 + $0x10] sm:$0xff]  ;;  %v1005_v35 = vld [vmem:[%s1175_s4 + $0x88] sm:$0xff]  ;;  %v70_v36 = vld [vmem:[%s1171_s0] sm:$0xff]  ;;  %vm486_vm3 = vcmp.ge.s32.totalorder %v1112_v62, 8  ;;  %vm487_vm4 = vcmp.lt.s32.totalorder %v1112_v62, 16  ;;  %vm492_vm6 = vcmp.ge.s32.totalorder %v1112_v62, 32 }
  0x14   :  { %587 = vmatprep.subr.mxu1 %v942_v25  ;;  %v72_v37 = vld [vmem:[%s1173_s2] sm:$0xff]  ;;  %v1017_v38 = vld [vmem:[%s1175_s4 + $0x8] sm:$0xff]  ;;  %v68_v42 = vld [vmem:[%s1178_s7 + $0x18] sm:$0xff]  ;;  %vm493_vm7 = vcmp.lt.s32.totalorder %v1112_v62, 40  ;;  %vm489_vm9 = vcmp.ge.s32.totalorder %v1112_v62, 16  ;;  %vm490_vm10 = vcmp.lt.s32.totalorder %v1112_v62, 32 }
  0x15   :  { %588 = vmatpush3.msra.mxu1 %v949_v26  ;;  %v1023_v39 = vld [vmem:[%s1175_s4 + $0x80] sm:$0xff]  ;;  %v74_v41 = vmul.f32 %v72_v37, %v70_v36  ;;  %665 = vmatpush3.msra.mxu0 %v68_v42  ;;  %v67_v43 = vld [vmem:[%s1178_s7 + $0x10] sm:$0xff]  ;;  %v66_v44 = vld [vmem:[%s1178_s7 + $0x8] sm:$0xff] }
  0x16   :  { %589 = vmatprep.subr.mxu1 %v957_v27  ;;  %v1029_v40 = vld [vmem:[%s1175_s4] sm:$0xff]  ;;  %666 = vmatprep.subr.mxu0 %v758_v4  ;;  %v306_v55 = vld [vmem:[%s1172_s1 + $0x8] sm:$0xff]  ;;  %v308_v57 = vld [vmem:[%s1172_s1 + $0x18] sm:$0xff] }
  0x17   :  { %590 = vmatpush3.msra.mxu1 %v963_v28  ;;  %667 = vmatpush3.msra.mxu0 %v67_v43  ;;  %v65_v45 = vld [vmem:[%s1178_s7] sm:$0xff]  ;;  %v307_v58 = vld [vmem:[%s1172_s1 + $0x10] sm:$0xff]  ;;  %v310_v59 = vld [vmem:[%s1172_s1 + $0x28] sm:$0xff] }
  0x18   :  { %591 = vmatprep.subr.mxu1 %v969_v29  ;;  %668 = vmatprep.subr.mxu0 %v758_v4  ;;  %v1059_v51 = vld [vmem:[%s1177_s6] ss:$0 sm:$0xff]  ;;  %vm1116_vm5 = vmand %vm486_vm3, %vm487_vm4 }
  0x19   :  { %592 = vmatpush3.msra.mxu1 %v975_v30  ;;  %669 = vmatpush3.msra.mxu0 %v66_v44  ;;  %v305_v56 = vld [vmem:[%s1172_s1] sm:$0xff]  ;;  %vm1127_vm8 = vmand %vm492_vm6, %vm493_vm7 }
  0x1a   :  { %593 = vmatprep.subr.mxu1 %v981_v31  ;;  %670 = vmatprep.subr.mxu0 %v758_v4  ;;  %v309_v60 = vld [vmem:[%s1172_s1 + $0x20] sm:$0xff]  ;;  %vm1146_vm11 = vmand %vm489_vm9, %vm490_vm10  ;;  %s760_s1 = smov [#allocation4]  }
  0x1b   :  { %594 = vmatpush3.msra.mxu1 %v987_v32  ;;  %671 = vmatpush3.msra.mxu0 %v65_v45  ;;  %s545_s14 = sshll.u32 %s760_s1, 4  ;;  %s546_s14 = int_to_ptr.vmem [resolvable:$true] %s545_s14 }
  0x1c   :  { %595 = vmatprep.subr.mxu1 %v993_v33  ;;  %609 = vmatprep.subr.mxu0 %v817_v0  ;;  %s714_s15 = scalar_lea.vmem %s546_s14, 384  ;;  %p719_p1 = scmp.lt.s32.totalorder %s546_s14, %s546_s14 }
  0x1d   :  { %596 = vmatpush3.msra.mxu1 %v999_v34  ;;  %p715_p0 = scmp.ne.s32.totalorder %s546_s14, %s714_s15  ;;  %p720_p2 = scmp.lt.s32.totalorder %s714_s15, %s714_s15 }
  0x1e   :  { %597 = vmatprep.subr.mxu1 %v1005_v35 }
  0x1f   :  { %598 = vmatpush3.msra.mxu1 %v1017_v38  ;;  %p721_p3 = por %p720_p2, %p719_p1 }
  0x20   :  { %599 = vmatprep.subr.mxu1 %v1023_v39 }
  0x21   :  { %600 = vmatpush3.msra.mxu1 %v1029_v40  ;;  %p722_p4 = pnand %p721_p3, %p715_p0 }
  0x22   :  { %218 = vmatmul.mubr.f32.vlgmr.msra.gmra.mxu1 %v74_v41  ;;  %675 = vmatprep.subr.mxu1 %v758_v4 }
  0x23   :  { %683 = vmatprep.mubr.msk.f32.mxu1 %vm759_vm0, %v758_v4  ;;  %676 = vmatpush3.msra.mxu1 %v68_v42 }
  0x24   :  { %677 = vmatprep.subr.mxu1 %v758_v4 }
  0x25   :  { %678 = vmatpush3.msra.mxu1 %v67_v43 }
  0x26   :  { %679 = vmatprep.subr.mxu1 %v758_v4 }
  0x27   :  { %680 = vmatpush3.msra.mxu1 %v66_v44 }
  0x28   :  { %681 = vmatprep.subr.mxu1 %v758_v4 }
  0x29   :  { %682 = vmatpush3.msra.mxu1 %v65_v45 }
  0xd0   :  { %v149_v46 = vpop.f32.mrf.mxu0 }
  0xd2   :  { %v663_v47 = vpop.f32.mrf.mxu0 }
  0xe2   :  { %v601_v48 = vpop.f32.mrf.mxu1 }
  0xe4   :  { %v602_v49 = vpop.f32.mrf.mxu1 }
  0xe5   :  { %v603_v50 = vadd.f32 %v602_v49, %v601_v48 }
  0xe7   :  { %v220_v52 = vadd.f32 %v603_v50, %v149_v46 }
  0xe9   :  { %v229_v53 = vadd.f32 %v1059_v51, %v220_v52 }
  0xeb   :  { %v230_v54 = vmax.f32 %v229_v53, 0.0 }
  0xed   :  { %673 = vmatmul.mubr.msk.f32.vlgmr.msra.gmra.mxu0 %vm231_vm2, %v230_v54 }
  0xee   :  { %610 = vmatpush3.msra.mxu0 %v822_v1  ;;  %375 = vmatprep.mubr.f32.mxu0 %v306_v55 }
  0xef   :  { %611 = vmatprep.subr.mxu0 %v827_v2 }
  0xf0   :  { %612 = vmatpush3.msra.mxu0 %v833_v3 }
  0xf1   :  { %613 = vmatprep.subr.mxu0 %v840_v5 }
  0xf2   :  { %614 = vmatpush3.msra.mxu0 %v848_v6 }
  0xf3   :  { %615 = vmatprep.subr.mxu0 %v854_v7 }
  0xf4   :  { %616 = vmatpush3.msra.mxu0 %v860_v8 }
  0xf5   :  { %617 = vmatprep.subr.mxu0 %v866_v9 }
  0xf6   :  { %618 = vmatpush3.msra.mxu0 %v872_v10 }
  0xf7   :  { %619 = vmatprep.subr.mxu0 %v878_v11 }
  0xf8   :  { %620 = vmatpush3.msra.mxu0 %v884_v12 }
  0xf9   :  { %621 = vmatprep.subr.mxu0 %v890_v13 }
  0xfa   :  { %622 = vmatpush3.msra.mxu0 %v899_v15 }
  0xfb   :  { %623 = vmatprep.subr.mxu0 %v911_v18 }
  0xfc   :  { %624 = vmatpush3.msra.mxu0 %v924_v22 }
  0xfd   :  { %625 = vmatprep.subr.mxu0 %v930_v23 }
  0xfe   :  { %626 = vmatpush3.msra.mxu0 %v936_v24 }
  0xff   :  { %627 = vmatprep.subr.mxu0 %v942_v25 }
 0x100   :  { %628 = vmatpush3.msra.mxu0 %v949_v26 }
 0x101   :  { %629 = vmatprep.subr.mxu0 %v957_v27 }
 0x102   :  { %630 = vmatpush3.msra.mxu0 %v963_v28 }
 0x103   :  { %631 = vmatprep.subr.mxu0 %v969_v29 }
 0x104   :  { %632 = vmatpush3.msra.mxu0 %v975_v30 }
 0x105   :  { %633 = vmatprep.subr.mxu0 %v981_v31 }
 0x106   :  { %634 = vmatpush3.msra.mxu0 %v987_v32 }
 0x107   :  { %635 = vmatprep.subr.mxu0 %v993_v33 }
 0x108   :  { %636 = vmatpush3.msra.mxu0 %v999_v34 }
 0x109   :  { %637 = vmatprep.subr.mxu0 %v1005_v35 }
 0x10a   :  { %638 = vmatpush3.msra.mxu0 %v1017_v38 }
 0x10b   :  { %639 = vmatprep.subr.mxu0 %v1023_v39 }
 0x10c   :  { %640 = vmatpush3.msra.mxu0 %v1029_v40 }
 0x10d   :  { %376 = vmatmul.mubr.f32.vlgmr.msra.gmra.mxu0 %v305_v56 }
 0x10e   :  { %380 = vmatprep.mubr.f32.mxu0 %v308_v57 }
 0x111   :  { %381 = vmatmul.mubr.f32.gmra.mxu0 %v307_v58 }
 0x112   :  { %385 = vmatprep.mubr.f32.mxu0 %v310_v59 }
 0x115   :  { %386 = vmatmul.mubr.f32.gmra.mxu0 %v309_v60 }
 0x1ad   :  { %v1122_v0 = vpop.f32.mrf.mxu0 }
 0x1ae   :  { %v496_v1 = vsel %vm1116_vm5, %v1122_v0, -inf  ;;  %v509_v5 = vsel %vm1127_vm8, %v1122_v0, -inf }
 0x1af   :  { %497 = vmax.xlane.f32.xlu0 %v496_v1  ;;  %v674_v2 = vpop.f32.mrf.mxu0 }
 0x1b3   :  { %510 = vmax.xlane.f32.xlu0 %v509_v5 }
 0x1cd   :  { %v641_v6 = vpop.f32.mrf.mxu0 }
 0x1cf   :  { %v642_v7 = vpop.f32.mrf.mxu0 }
 0x1d0   :  { %v643_v8 = vadd.f32 %v642_v7, %v641_v6 }
 0x1d1   :  { %v644_v9 = vpop.f32.mrf.mxu0 }
 0x1d2   :  { %v378_v10 = vadd.f32 %v643_v8, %v1059_v51 }
 0x1d3   :  { %v645_v11 = vpop.f32.mrf.mxu0 }
 0x1d4   :  { %v391_v12 = vmax.f32 %v378_v10, 0.0  ;;  %v646_v13 = vadd.f32 %v645_v11, %v644_v9 }
 0x1d5   :  { %v647_v14 = vpop.f32.mrf.mxu0 }
 0x1d6   :  { %v383_v15 = vadd.f32 %v646_v13, %v1059_v51  ;;  %684 = vmatmul.mubr.msk.f32.vlgmr.msra.gmra.mxu1 %vm231_vm2, %v391_v12 }
 0x1d7   :  { %v648_v16 = vpop.f32.mrf.mxu0  ;;  %686 = vmatprep.mubr.msk.f32.mxu1 %vm759_vm0, %v758_v4 }
 0x1d8   :  { %v392_v17 = vmax.f32 %v383_v15, 0.0  ;;  %v649_v18 = vadd.f32 %v648_v16, %v647_v14 }
 0x1da   :  { %v388_v19 = vadd.f32 %v649_v18, %v1059_v51  ;;  %687 = vmatmul.mubr.msk.f32.gmra.mxu1 %vm231_vm2, %v392_v17 }
 0x1db   :  { %689 = vmatprep.mubr.msk.f32.mxu1 %vm759_vm0, %v758_v4 }
 0x1dc   :  { %v393_v20 = vmax.f32 %v388_v19, 0.0 }
 0x1de   :  { %690 = vmatmul.mubr.msk.f32.gmra.mxu1 %vm231_vm2, %v393_v20 }
 0x238   :  { %v498_v21 = vpop.xlane.xlu0 %497 }
 0x239   :  { %v499_v22 = vsub.f32 %v496_v1, %v498_v21 }
 0x23b   :  { %v500_v23 = vmul.f32 1.442695, %v499_v22 }
 0x23c   :  { %v511_v24 = vpop.xlane.xlu0 %510 }
 0x23d   :  { %698 = vpow2.f32 %v500_v23  ;;  %v512_v25 = vsub.f32 %v509_v5, %v511_v24 }
 0x23f   :  { %v513_v26 = vmul.f32 1.442695, %v512_v25 }
 0x241   :  { %700 = vpow2.f32 %v513_v26 }
 0x24a   :  { %v699_v27 = vpop.eup %698 }
 0x24b   :  { %502 = vadd.xlane.f32.xlu1 %v699_v27 }
 0x24e   :  { %v701_v28 = vpop.eup %700 }
 0x24f   :  { %515 = vadd.xlane.f32.xlu1 %v701_v28 }
 0x296   :  { %v469_v29 = vpop.f32.mrf.mxu1 }
 0x297   :  { %702 = vtanh.f32 %v469_v29 }
 0x298   :  { %v685_v30 = vpop.f32.mrf.mxu1 }
 0x29a   :  { %v474_v31 = vpop.f32.mrf.mxu1 }
 0x29b   :  { %704 = vtanh.f32 %v474_v31 }
 0x29c   :  { %v688_v4 = vpop.f32.mrf.mxu1 }
 0x29e   :  { %v479_v32 = vpop.f32.mrf.mxu1 }
 0x29f   :  { %706 = vtanh.f32 %v479_v32 }
 0x2a0   :  { %v691_v33 = vpop.f32.mrf.mxu1 }
 0x2a4   :  { %v703_v35 = vpop.eup %702 }
 0x2a5   :  { %v524_v36 = vsel %vm1146_vm11, %v703_v35, 0.0 }
 0x2a6   :  { %527 = vst [vmem:[#allocation4] sm:$0xff] %v524_v36 }
 0x2a8   :  { %v705_v37 = vpop.eup %704 }
 0x2a9   :  { %v525_v38 = vsel %vm1146_vm11, %v705_v37, 0.0 }
 0x2aa   :  { %528 = vst [vmem:[#allocation4 + $0x8] sm:$0xff] %v525_v38 }
 0x2ac   :  { %v707_v39 = vpop.eup %706 }
 0x2ad   :  { %v526_v40 = vsel %vm1146_vm11, %v707_v39, 0.0 }
 0x2ae   :  { %529 = vst [vmem:[#allocation4 + $0x10] sm:$0xff] %v526_v40 }
 0x2af   :  { %725 = shalt.err (!%p722_p4)
}
 0x2b0   :  { %s761_s16 = smov 128   ;;  %s762_s17 = smov 8   ;;  %vm485_vm12 = vcmp.lt.s32.totalorder %v1112_v62, 8 }
 0x2b1   :  { %551 = dma.vmem_to_hbm [thread:$0]  %s546_s14, 384, %s1180_s9, [#allocation5], %s761_s16, %s761_s16, %s762_s17   ;;  %v495_v45 = vsel %vm485_vm12, %v1122_v0, 0.0 }
 0x2b2   :  { %s763_s2 = smov [#allocation2]  }
 0x2b3   :  { %s536_s19 = sshll.u32 %s763_s2, 4  ;;  %s537_s19 = int_to_ptr.vmem [resolvable:$true] %s536_s19 }
 0x2b4   :  { %s734_s9 = scalar_lea.vmem %s537_s19, 128  ;;  %p739_p6 = scmp.lt.s32.totalorder %s537_s19, %s537_s19 }
 0x2b5   :  { %p735_p5 = scmp.ne.s32.totalorder %s537_s19, %s734_s9  ;;  %p740_p7 = scmp.lt.s32.totalorder %s734_s9, %s734_s9 }
 0x2b7   :  { %p741_p8 = por %p740_p7, %p739_p6 }
 0x2b9   :  { %p742_p9 = pnand %p741_p8, %p735_p5 }
 0x2d4   :  { %v503_v41 = vpop.xlane.xlu1 %502 }
 0x2d5   :  { %708 = vrcp.f32 %v503_v41 }
 0x2d8   :  { %v516_v42 = vpop.xlane.xlu1 %515 }
 0x2d9   :  { %710 = vrcp.f32 %v516_v42 }
 0x2da   :  { %712 = vtanh.f32 %v1122_v0 }
 0x2e2   :  { %v709_v43 = vpop.eup %708 }
 0x2e3   :  { %v505_v44 = vmul.f32 %v709_v43, %v699_v27 }
 0x2e5   :  { %v506_v46 = vsel %vm1116_vm5, %v505_v44, %v495_v45 }
 0x2e6   :  { %v711_v47 = vpop.eup %710 }
 0x2e7   :  { %v713_v48 = vpop.eup %712  ;;  %v518_v49 = vmul.f32 %v711_v47, %v701_v28 }
 0x2e8   :  { %v508_v50 = vsel %vm1146_vm11, %v713_v48, %v506_v46 }
 0x2e9   :  { %v519_v51 = vsel %vm1127_vm8, %v518_v49, %v508_v50 }
 0x2ea   :  { %520 = vst [vmem:[#allocation2] sm:$0xff] %v519_v51 }
 0x2eb   :  { %745 = shalt.err (!%p742_p9)
}
 0x2ec   :  { %539 = dma.vmem_to_hbm [thread:$0]  %s537_s19, 128, %s1179_s8, [#allocation3]  }
 0x2ed   :  { %754 = dma.done.wait [#allocation3], 128  }
 0x2ee   :  { %755 = vsyncadd [#allocation3], 4294967168 }
 0x2ef   :  { %756 = dma.done.wait [#allocation5], 384  }
 0x2f0   :  { %757 = vsyncadd [#allocation5], 4294966912 }
 0x2f1   :  { %558 = vsyncpa [#allocation3], 1 }
 0x2f2   :  { %559 = vsyncpa [#allocation5], 1 }

</bundles_post_ra>
